<compile_context>
chip_gen: v7x
topology: tpu7x:2x2x1
jax: 0.10.0
libtpu: 0.0.40
codegen_flags: <defaults>
</compile_context>

<pallas_src>
import functools

import jax
import jax.numpy as jnp
from jax.experimental import pallas as pl
from jax.experimental.pallas import tpu as pltpu

d_model = 768
max_len = 30
vocab_size = 4          # {'[PAD]','[CLS]','[SEP]','[MASK]'}
n_segments = 2
TOTAL_V = vocab_size + max_len + n_segments   # 36 (fused vocab)
PADDED_V = 128                                 # fused vocab padded to one lane tile
SUM_COL = TOTAL_V                              # column of the stats table holding row-sums
LN_EPS = 1e-5
MAX_TILE = 2048                                # rows per grid step (store-bound tile)


def _round_up(x, m):
    return ((x + m - 1) // m) * m


def embedding_kernel(tok_ref, tbl_ref, stat_ref, gamma_ref, beta_ref, out_ref):
    # tok_ref : (TILE_N, 3) int32, ids already offset into the fused table
    # tbl_ref : (PADDED_V, d_model) f32 fused embedding table (resident)
    # stat_ref: (PADDED_V, PADDED_V) f32, [0:36,0:36]=Gram, [:,36]=row-sums (resident)
    tok = tok_ref[...]
    tile_n = tok.shape[0]

    # Combined one-hot over the padded fused vocab (the three id ranges are
    # disjoint, max valid id = 35, so lanes >= 36 are never hit).
    iota = jax.lax.broadcasted_iota(jnp.int32, (tile_n, PADDED_V), 1)
    oh = ((iota == tok[:, 0:1])
          | (iota == tok[:, 1:2])
          | (iota == tok[:, 2:3])).astype(jnp.float32)

    # Single MXU contraction replaces three gathers + two adds.
    x = jnp.dot(oh, tbl_ref[...], preferred_element_type=jnp.float32)

    # LayerNorm statistics on the MXU (see header): one small (K=128, N=128)
    # matmul; only a 128-lane elementwise+reduce remains on VPU/XLU.
    s = jnp.dot(oh, stat_ref[...], preferred_element_type=jnp.float32)
    row_sum = s[:, SUM_COL:SUM_COL + 1]                        # sum_j x_ij
    row_sq = jnp.sum(s * oh, axis=-1, keepdims=True)           # sum_j x_ij^2 (oh[:,36]==0)

    inv_d = jnp.float32(1.0 / d_model)
    mean = row_sum * inv_d
    var = jnp.maximum(row_sq * inv_d - mean * mean, 0.0)        # guard f32 cancellation
    inv_std = jax.lax.rsqrt(var + LN_EPS)
    out_ref[...] = ((x - mean) * inv_std * gamma_ref[...]
                    + beta_ref[...]).astype(out_ref.dtype)


def make_embedding_params(inp_tbl, pos_tbl, seg_tbl, gamma, beta):
    """Hoisted per-model preprocessing: fused table, Gram/stats table, affine."""
    tbl = jnp.concatenate([inp_tbl, pos_tbl, seg_tbl], axis=0).astype(jnp.float32)
    tbl_pad = jnp.zeros((PADDED_V, d_model), jnp.float32).at[:TOTAL_V].set(tbl)
    # Gram matrix in full f32 precision (feeds the variance); padded rows are zero.
    gram = jnp.dot(tbl_pad, tbl_pad.T, precision=jax.lax.Precision.HIGHEST)
    rowsum = jnp.sum(tbl_pad, axis=-1)
    stat = gram.at[:, SUM_COL].set(rowsum)     # column 36 of Gram is all-zero (pad row)
    gamma2 = gamma.reshape(1, d_model).astype(jnp.float32)
    beta2 = beta.reshape(1, d_model).astype(jnp.float32)
    return tbl_pad, stat, gamma2, beta2


def bert_embedding(input_token, pos_token, segment_token, params,
                   out_dtype=jnp.float32):
    # out_dtype=jnp.bfloat16 halves the dominant HBM store if downstream allows it.
    tbl_pad, stat, gamma2, beta2 = params
    B, S = input_token.shape
    N = B * S

    # Pack tokens as (N, 3) int32 with offsets into the fused table.
    tok = jnp.stack(
        [input_token.astype(jnp.int32),
         pos_token.astype(jnp.int32) + vocab_size,
         segment_token.astype(jnp.int32) + vocab_size + max_len],
        axis=-1,
    ).reshape(N, 3)

    # Row tiling: large lane-dense output tiles, no padding / post-slice.
    if N <= MAX_TILE:
        tile_n = N                      # single full block (any N is legal)
        grid_n = 1
    else:
        grid_n = pl.cdiv(N, MAX_TILE)
        if grid_n % 2:                  # even grid -> both v7x TensorCores get equal work
            grid_n += 1
        tile_n = _round_up(pl.cdiv(N, grid_n), 8)
        grid_n = pl.cdiv(N, tile_n)     # ragged last block is masked by Pallas

    # VMEM budget: 2x output tile (double buffer) + a few output-tile-sized
    # intermediates; clamp to stay inside v7x's 64 MiB physical VMEM.
    out_tile_mib = (tile_n * d_model * 4) >> 20
    vmem_limit = min(64, max(32, 6 * out_tile_mib + 8)) << 20

    cost = pl.CostEstimate(
        flops=2 * N * PADDED_V * (d_model + PADDED_V),
        transcendentals=N,
        bytes_accessed=(N * d_model * 4                     # output (dominant)
                        + N * 3 * 4                         # tokens
                        + PADDED_V * (d_model + PADDED_V) * 4   # tables
                        + 2 * d_model * 4),                 # gamma/beta
    )

    out = pl.pallas_call(
        embedding_kernel,
        out_shape=jax.ShapeDtypeStruct((N, d_model), out_dtype),
        grid=(grid_n,),
        in_specs=[
            pl.BlockSpec((tile_n, 3), lambda i: (i, 0)),            # tokens (blocked)
            pl.BlockSpec((PADDED_V, d_model), lambda i: (0, 0)),    # fused table (resident)
            pl.BlockSpec((PADDED_V, PADDED_V), lambda i: (0, 0)),   # Gram/stats (resident)
            pl.BlockSpec((1, d_model), lambda i: (0, 0)),           # gamma (resident)
            pl.BlockSpec((1, d_model), lambda i: (0, 0)),           # beta  (resident)
        ],
        out_specs=pl.BlockSpec((tile_n, d_model), lambda i: (i, 0)),
        compiler_params=pltpu.CompilerParams(
            dimension_semantics=("parallel",),
            vmem_limit_bytes=int(vmem_limit)),
        cost_estimate=cost,
    )(tok, tbl_pad, stat, gamma2, beta2)

    return out.reshape(B, S, d_model)


def _reference(input_token, pos_token, segment_token,
               inp_tbl, pos_tbl, seg_tbl, gamma, beta):
    x = inp_tbl[input_token] + pos_tbl[pos_token] + seg_tbl[segment_token]
    mean = jnp.mean(x, axis=-1, keepdims=True)
    var = jnp.mean((x - mean) ** 2, axis=-1, keepdims=True)
    return (x - mean) * jax.lax.rsqrt(var + LN_EPS) * gamma + beta


if __name__ == "__main__":
    key = jax.random.PRNGKey(0)
    k_inp, k_pos, k_seg, k_g, k_b, k_tok, k_segid, k_tok2, k_segid2 = jax.random.split(key, 9)

    # Parameters (nn.Embedding init ~ N(0,1); LayerNorm affine randomized to
    # exercise gamma/beta — default init would be ones/zeros).
    inp_tbl = jax.random.normal(k_inp, (vocab_size, d_model), dtype=jnp.float32)
    pos_tbl = jax.random.normal(k_pos, (max_len, d_model), dtype=jnp.float32)
    seg_tbl = jax.random.normal(k_seg, (n_segments, d_model), dtype=jnp.float32)
    gamma = 1.0 + 0.1 * jax.random.normal(k_g, (d_model,), dtype=jnp.float32)
    beta = 0.1 * jax.random.normal(k_b, (d_model,), dtype=jnp.float32)

    params = make_embedding_params(inp_tbl, pos_tbl, seg_tbl, gamma, beta)

    # Case 1: B=2, S=8
    B, S = 2, 8
    input_token = jax.random.randint(k_tok, (B, S), 0, vocab_size, dtype=jnp.int32)
    pos_token = jnp.broadcast_to(jnp.arange(S, dtype=jnp.int32), (B, S))
    segment_token = jax.random.randint(k_segid, (B, S), 0, n_segments, dtype=jnp.int32)

    out = jax.block_until_ready(
        bert_embedding(input_token, pos_token, segment_token, params))
    ref = _reference(input_token, pos_token, segment_token,
                     inp_tbl, pos_tbl, seg_tbl, gamma, beta)
    assert out.shape == (B, S, d_model)
    assert jnp.allclose(out, ref, atol=1e-4, rtol=1e-4)

    # Case 2: full max_len sequence (covers every positional row; N not 8-aligned).
    B2, S2 = 2, max_len
    input_token2 = jax.random.randint(k_tok2, (B2, S2), 0, vocab_size, dtype=jnp.int32)
    pos_token2 = jnp.broadcast_to(jnp.arange(S2, dtype=jnp.int32), (B2, S2))
    segment_token2 = jax.random.randint(k_segid2, (B2, S2), 0, n_segments, dtype=jnp.int32)

    out2 = jax.block_until_ready(
        bert_embedding(input_token2, pos_token2, segment_token2, params))
    ref2 = _reference(input_token2, pos_token2, segment_token2,
                      inp_tbl, pos_tbl, seg_tbl, gamma, beta)
    assert out2.shape == (B2, S2, d_model)
    assert jnp.allclose(out2, ref2, atol=1e-4, rtol=1e-4)

    # TODO(synk): out-of-range token ids produce an all-zero embedding row
    # (one-hot miss) rather than raising like nn.Embedding; valid ids behave
    # identically to nn.Embedding.

    print("KERNEL_OK")
</pallas_src>

<mosaic_0001>
module attributes {stable_mosaic.version = 11 : i64} {
  func.func @embedding_kernel(%arg0: i32, %arg1: memref<16x3xi32, #tpu.memory_space<vmem>>, %arg2: memref<128x768xf32, #tpu.memory_space<vmem>>, %arg3: memref<128x128xf32, #tpu.memory_space<vmem>>, %arg4: memref<1x768xf32, #tpu.memory_space<vmem>>, %arg5: memref<1x768xf32, #tpu.memory_space<vmem>>, %arg6: memref<16x768xf32, #tpu.memory_space<vmem>>) attributes {dimension_semantics = [#tpu.dimension_semantics<parallel>], iteration_bounds = array<i64: 1>, scalar_prefetch = 0 : i64, scratch_operands = 0 : i64, tpu.core_type = #tpu.core_type<tc>, window_params = [{transform_indices = @transform_0, window_bounds = array<i64: 16, 3>}, {pipeline_mode = #tpu.pipeline_mode<synchronous>, transform_indices = @transform_1, window_bounds = array<i64: 128, 768>}, {pipeline_mode = #tpu.pipeline_mode<synchronous>, transform_indices = @transform_2, window_bounds = array<i64: 128, 128>}, {pipeline_mode = #tpu.pipeline_mode<synchronous>, transform_indices = @transform_3, window_bounds = array<i64: 1, 768>}, {pipeline_mode = #tpu.pipeline_mode<synchronous>, transform_indices = @transform_4, window_bounds = array<i64: 1, 768>}, {transform_indices = @transform_5, window_bounds = array<i64: 16, 768>}]} {
    %c0 = arith.constant 0 : index
    %c0_0 = arith.constant 0 : index
    %0 = vector.load %arg1[%c0, %c0_0] : memref<16x3xi32, #tpu.memory_space<vmem>>, vector<16x3xi32>
    %1 = tpu.iota {dimensions = array<i32: 1>} : vector<16x128xi32>
    %2 = vector.extract_strided_slice %0 {offsets = [0, 0], sizes = [16, 1], strides = [1, 1]} : vector<16x3xi32> to vector<16x1xi32>
    %3 = vector.broadcast %2 : vector<16x1xi32> to vector<16x128xi32>
    %4 = arith.cmpi eq, %1, %3 : vector<16x128xi32>
    %5 = vector.extract_strided_slice %0 {offsets = [0, 1], sizes = [16, 1], strides = [1, 1]} : vector<16x3xi32> to vector<16x1xi32>
    %6 = vector.broadcast %5 : vector<16x1xi32> to vector<16x128xi32>
    %7 = arith.cmpi eq, %1, %6 : vector<16x128xi32>
    %8 = arith.ori %4, %7 : vector<16x128xi1>
    %9 = vector.extract_strided_slice %0 {offsets = [0, 2], sizes = [16, 1], strides = [1, 1]} : vector<16x3xi32> to vector<16x1xi32>
    %10 = vector.broadcast %9 : vector<16x1xi32> to vector<16x128xi32>
    %11 = arith.cmpi eq, %1, %10 : vector<16x128xi32>
    %12 = arith.ori %8, %11 : vector<16x128xi1>
    %13 = arith.extui %12 : vector<16x128xi1> to vector<16x128xi32>
    %14 = arith.sitofp %13 : vector<16x128xi32> to vector<16x128xf32>
    %c0_1 = arith.constant 0 : index
    %c0_2 = arith.constant 0 : index
    %15 = vector.load %arg2[%c0_1, %c0_2] : memref<128x768xf32, #tpu.memory_space<vmem>>, vector<128x768xf32>
    %cst = arith.constant dense<0.000000e+00> : vector<16x768xf32>
    %16 = tpu.matmul %14, %15, %cst {dimension_numbers = #tpu.dot_dimension_numbers<[1], [0], [0], [1], [0, 0, 1, 1], [], []>} : vector<16x128xf32>, vector<128x768xf32>, vector<16x768xf32> -> vector<16x768xf32>
    %c0_3 = arith.constant 0 : index
    %c0_4 = arith.constant 0 : index
    %17 = vector.load %arg3[%c0_3, %c0_4] : memref<128x128xf32, #tpu.memory_space<vmem>>, vector<128x128xf32>
    %cst_5 = arith.constant dense<0.000000e+00> : vector<16x128xf32>
    %18 = tpu.matmul %14, %17, %cst_5 {dimension_numbers = #tpu.dot_dimension_numbers<[1], [0], [0], [1], [0, 0, 1, 1], [], []>} : vector<16x128xf32>, vector<128x128xf32>, vector<16x128xf32> -> vector<16x128xf32>
    %19 = vector.extract_strided_slice %18 {offsets = [0, 36], sizes = [16, 1], strides = [1, 1]} : vector<16x128xf32> to vector<16x1xf32>
    %20 = arith.mulf %18, %14 : vector<16x128xf32>
    %cst_6 = arith.constant dense<0.000000e+00> : vector<16xf32>
    %21 = vector.multi_reduction <add>, %20, %cst_6 [1] : vector<16x128xf32> to vector<16xf32>
    %22 = vector.shape_cast %21 : vector<16xf32> to vector<16x1xf32>
    %cst_7 = arith.constant 0.00130208337 : f32
    %23 = vector.broadcast %cst_7 : f32 to vector<16x1xf32>
    %24 = arith.mulf %19, %23 : vector<16x1xf32>
    %cst_8 = arith.constant 0.00130208337 : f32
    %25 = vector.broadcast %cst_8 : f32 to vector<16x1xf32>
    %26 = arith.mulf %22, %25 : vector<16x1xf32>
    %27 = arith.mulf %24, %24 : vector<16x1xf32>
    %28 = arith.subf %26, %27 : vector<16x1xf32>
    %cst_9 = arith.constant 0.000000e+00 : f32
    %29 = vector.broadcast %cst_9 : f32 to vector<16x1xf32>
    %30 = arith.maximumf %28, %29 : vector<16x1xf32>
    %cst_10 = arith.constant 9.99999974E-6 : f32
    %31 = vector.broadcast %cst_10 : f32 to vector<16x1xf32>
    %32 = arith.addf %30, %31 : vector<16x1xf32>
    %33 = math.rsqrt %32 : vector<16x1xf32>
    %34 = vector.broadcast %24 : vector<16x1xf32> to vector<16x768xf32>
    %35 = arith.subf %16, %34 : vector<16x768xf32>
    %36 = vector.broadcast %33 : vector<16x1xf32> to vector<16x768xf32>
    %37 = arith.mulf %35, %36 : vector<16x768xf32>
    %c0_11 = arith.constant 0 : index
    %c0_12 = arith.constant 0 : index
    %38 = vector.load %arg4[%c0_11, %c0_12] : memref<1x768xf32, #tpu.memory_space<vmem>>, vector<1x768xf32>
    %39 = vector.broadcast %38 : vector<1x768xf32> to vector<16x768xf32>
    %40 = arith.mulf %37, %39 : vector<16x768xf32>
    %c0_13 = arith.constant 0 : index
    %c0_14 = arith.constant 0 : index
    %41 = vector.load %arg5[%c0_13, %c0_14] : memref<1x768xf32, #tpu.memory_space<vmem>>, vector<1x768xf32>
    %42 = vector.broadcast %41 : vector<1x768xf32> to vector<16x768xf32>
    %43 = arith.addf %40, %42 : vector<16x768xf32>
    %c0_15 = arith.constant 0 : index
    %c0_16 = arith.constant 0 : index
    %44 = vector.load %arg6[%c0_15, %c0_16] : memref<16x768xf32, #tpu.memory_space<vmem>>, vector<16x768xf32>
    tpu.vector_store %arg6[%c0_15, %c0_16], %43 {strides = array<i32>} : memref<16x768xf32, #tpu.memory_space<vmem>>, vector<16x768xf32>,
    return
  }
  func.func @transform_0(%arg0: i32) -> (i32, i32) {
    %c0_i32 = arith.constant 0 : i32
    %c0_i32_0 = arith.constant 0 : i32
    return %arg0, %c0_i32 : i32, i32
  }
  func.func @transform_1(%arg0: i32) -> (i32, i32) {
    %c0_i32 = arith.constant 0 : i32
    %c0_i32_0 = arith.constant 0 : i32
    %c0_i32_1 = arith.constant 0 : i32
    return %c0_i32, %c0_i32_0 : i32, i32
  }
  func.func @transform_2(%arg0: i32) -> (i32, i32) {
    %c0_i32 = arith.constant 0 : i32
    %c0_i32_0 = arith.constant 0 : i32
    %c0_i32_1 = arith.constant 0 : i32
    return %c0_i32, %c0_i32_0 : i32, i32
  }
  func.func @transform_3(%arg0: i32) -> (i32, i32) {
    %c0_i32 = arith.constant 0 : i32
    %c0_i32_0 = arith.constant 0 : i32
    %c0_i32_1 = arith.constant 0 : i32
    return %c0_i32, %c0_i32_0 : i32, i32
  }
  func.func @transform_4(%arg0: i32) -> (i32, i32) {
    %c0_i32 = arith.constant 0 : i32
    %c0_i32_0 = arith.constant 0 : i32
    %c0_i32_1 = arith.constant 0 : i32
    return %c0_i32, %c0_i32_0 : i32, i32
  }
  func.func @transform_5(%arg0: i32) -> (i32, i32) {
    %c0_i32 = arith.constant 0 : i32
    %c0_i32_0 = arith.constant 0 : i32
    return %arg0, %c0_i32 : i32, i32
  }
}

</mosaic_0001>

<bundles_post_ra>
// kernel: tpu_custom_call.1
= control target key start
LH: loop header
LB: loop body
LE: loop exit
PB: predicated region body
PF: predicated region fallthrough
CT: control target
= control target key end

     0   :  { %10 = vsyncpa [#allocation3], 0  ;;  %s1161_s0 = inlined_call_operand.vmem [shape: s32[16,3], index: 0, kind: input, shape index: {}]   ;;  %s1162_s1 = inlined_call_operand.hbm [shape: f32[128,768], index: 1, kind: input, shape index: {}]   ;;  %s1163_s2 = inlined_call_operand.hbm [shape: f32[128,128], index: 2, kind: input, shape index: {}]   ;;  %s1164_s3 = inlined_call_operand.vmem [shape: f32[1,768], index: 3, kind: input, shape index: {}]   ;;  %s1165_s4 = inlined_call_operand.vmem [shape: f32[1,768], index: 4, kind: input, shape index: {}]   ;;  %s1166_s5 = inlined_call_operand.hbm [shape: f32[16,768], index: 5, kind: output, shape index: {}]  }
   0x1   :  { %11 = vsyncpa [#allocation6], 0 }
   0x2   :  { %12 = vsyncpa [#allocation4], 0  ;;  %s973_s18 = smov [#allocation2]   ;;  %s901_s22 = scalar_lea.hbm %s1162_s1, 12288 }
   0x3   :  { %s20_s19 = sshll.u32 %s973_s18, 4  ;;  %p902_p0 = scmp.ne.s32.totalorder %s1162_s1, %s901_s22  ;;  %s21_s19 = int_to_ptr.vmem [resolvable:$true] %s20_s19 }
   0x4   :  { %p905_p1 = scmp.lt.u32.totalorder %s901_s22, %s1162_s1 }
   0x6   :  { %p907_p2 = pnand %p905_p1, %p902_p0 }
   0x8   :  { %910 = shalt.err (!%p907_p2)
}
   0x9   :  { %s911_s27 = scalar_lea.vmem %s21_s19, 12288  ;;  %p916_p4 = scmp.lt.s32.totalorder %s21_s19, %s21_s19 }
   0xa   :  { %p912_p3 = scmp.ne.s32.totalorder %s21_s19, %s911_s27  ;;  %p917_p5 = scmp.lt.s32.totalorder %s911_s27, %s911_s27 }
   0xc   :  { %p918_p6 = por %p917_p5, %p916_p4 }
   0xe   :  { %p919_p7 = pnand %p918_p6, %p912_p3 }
  0x10   :  { %922 = shalt.err (!%p919_p7)
}
  0x11   :  { %s974_s28 = smov 768   ;;  %s975_s29 = smov 48  }
  0x12   :  { %26 = dma.hbm_to_vmem [thread:$0]  %s1162_s1, 12288, %s21_s19, [#allocation3], %s974_s28, %s974_s28, %s975_s29  }
  0x13   :  { %s976_s7 = smov [#allocation5]   ;;  %s923_s11 = scalar_lea.hbm %s1163_s2, 2048 }
  0x14   :  { %s32_s8 = sshll.u32 %s976_s7, 4  ;;  %p924_p8 = scmp.ne.s32.totalorder %s1163_s2, %s923_s11  ;;  %s33_s8 = int_to_ptr.vmem [resolvable:$true] %s32_s8 }
  0x15   :  { %p927_p9 = scmp.lt.u32.totalorder %s923_s11, %s1163_s2 }
  0x17   :  { %p929_p10 = pnand %p927_p9, %p924_p8 }
  0x19   :  { %932 = shalt.err (!%p929_p10)
}
  0x1a   :  { %s933_s16 = scalar_lea.vmem %s33_s8, 2048  ;;  %p938_p12 = scmp.lt.s32.totalorder %s33_s8, %s33_s8 }
  0x1b   :  { %p934_p11 = scmp.ne.s32.totalorder %s33_s8, %s933_s16  ;;  %p939_p13 = scmp.lt.s32.totalorder %s933_s16, %s933_s16 }
  0x1d   :  { %p940_p0 = por %p939_p13, %p938_p12 }
  0x1f   :  { %p941_p1 = pnand %p940_p0, %p934_p11 }
  0x21   :  { %944 = shalt.err (!%p941_p1)
}
  0x22   :  { %s977_s1 = smov 128   ;;  %s978_s17 = smov 8  }
  0x23   :  { %38 = dma.hbm_to_vmem [thread:$0]  %s1163_s2, 2048, %s33_s8, [#allocation6], %s977_s1, %s977_s1, %s978_s17  }
  0x24   :  { %967 = dma.done.wait [#allocation3], 12288  }
  0x25   :  { %968 = vsyncadd [#allocation3], 4294955008 }
  0x26   :  { %969 = dma.done.wait [#allocation6], 2048  }
  0x27   :  { %970 = vsyncadd [#allocation6], 4294965248  ;;  %v979_v0 = vmov 2   ;;  %v980_v1 = vmov 0   ;;  %v49_v2 = vld [vmem:[%s1161_s0] sm:$0xff]  ;;  %v86_v3 = vld [vmem:[#allocation2 + $0x8] sm:$0xff] }
  0x28   :  { %891 = vset.pattern.permute.xlu1 %v979_v0  ;;  %889 = vset.pattern.permute.xlu0 %v980_v1  ;;  %v50_v4 = vld [vmem:[%s1161_s0 + $0x8] sm:$0xff]  ;;  %v92_v5 = vld [vmem:[#allocation2 + $0x38] sm:$0xff]  ;;  %v85_v10 = vld [vmem:[#allocation2] sm:$0xff]  ;;  %v981_v22 = vmov 1   ;;  %v982_v40 = vmov 0.0  }
  0x29   :  { %72 = vperm.xlu1 %891, %v49_v2   ;;  %54 = vperm.xlu0 %889, %v49_v2   ;;  %v88_v6 = vld [vmem:[#allocation2 + $0x18] sm:$0xff]  ;;  %v94_v7 = vld [vmem:[#allocation2 + $0x48] sm:$0xff]  ;;  %v748_v8 = vpack.c.bf16 %v92_v5, %v86_v3  ;;  %v91_v11 = vld [vmem:[#allocation2 + $0x30] sm:$0xff] }
  0x2a   :  { %v780_v9 = vpack.c.bf16 %v94_v7, %v88_v6  ;;  %v87_v12 = vld [vmem:[#allocation2 + $0x10] sm:$0xff]  ;;  %v750_v13 = vpack.c.bf16 %v91_v11, %v85_v10  ;;  %v93_v14 = vld [vmem:[#allocation2 + $0x40] sm:$0xff]  ;;  %v98_v15 = vld [vmem:[#allocation2 + $0x68] sm:$0xff]  ;;  %245 = vmatprep.mubr.f32.mxu0 %v982_v40  ;;  %322 = vmatprep.mubr.f32.mxu1 %v982_v40 }
  0x2b   :  { %v104_v16 = vld [vmem:[#allocation2 + $0x98] sm:$0xff]  ;;  %749 = vmatprep.subr.bf16.mxu0 %v748_v8  ;;  %v782_v17 = vpack.c.bf16 %v93_v14, %v87_v12  ;;  %v106_v20 = vld [vmem:[#allocation2 + $0xa8] sm:$0xff]  ;;  %v97_v21 = vld [vmem:[#allocation2 + $0x60] sm:$0xff] }
  0x2c   :  { %781 = vmatprep.subr.bf16.mxu1 %v780_v9  ;;  %v752_v18 = vpack.c.bf16 %v104_v16, %v98_v15  ;;  %v100_v19 = vld [vmem:[#allocation2 + $0x78] sm:$0xff]  ;;  %v103_v24 = vld [vmem:[#allocation2 + $0x90] sm:$0xff]  ;;  %v105_v26 = vld [vmem:[#allocation2 + $0xa0] sm:$0xff]  ;;  %751 = vmatpush1.bf16.msra.mxu0 %v750_v13 }
  0x2d   :  { %892 = vset.pattern.permute.xlu1 %v980_v1  ;;  %890 = vset.pattern.permute.xlu0 %v981_v22  ;;  %v784_v23 = vpack.c.bf16 %v106_v20, %v100_v19  ;;  %v99_v25 = vld [vmem:[#allocation2 + $0x70] sm:$0xff]  ;;  %v110_v27 = vld [vmem:[#allocation2 + $0xc8] sm:$0xff]  ;;  %v116_v28 = vld [vmem:[#allocation2 + $0xf8] sm:$0xff]  ;;  %v754_v31 = vpack.c.bf16 %v103_v24, %v97_v21 }
  0x2e   :  { %57 = vperm.xlu1 %892, %v50_v4   ;;  %62 = vperm.xlu0 %890, %v49_v2   ;;  %v112_v29 = vld [vmem:[#allocation2 + $0xd8] sm:$0xff]  ;;  %v118_v30 = vld [vmem:[#allocation2 + $0x108] sm:$0xff]  ;;  %v786_v32 = vpack.c.bf16 %v105_v26, %v99_v25  ;;  %v109_v33 = vld [vmem:[#allocation2 + $0xc0] sm:$0xff]  ;;  %v756_v35 = vpack.c.bf16 %v116_v28, %v110_v27 }
  0x2f   :  { %783 = vmatpush1.bf16.msra.mxu1 %v782_v17  ;;  %753 = vmatprep.subr.bf16.mxu0 %v752_v18  ;;  %v115_v34 = vld [vmem:[#allocation2 + $0xf0] sm:$0xff]  ;;  %v788_v36 = vpack.c.bf16 %v118_v30, %v112_v29  ;;  %v117_v38 = vld [vmem:[#allocation2 + $0x100] sm:$0xff]  ;;  %v122_v39 = vld [vmem:[#allocation2 + $0x128] sm:$0xff] }
  0x30   :  { %785 = vmatprep.subr.bf16.mxu1 %v784_v23  ;;  %v111_v37 = vld [vmem:[#allocation2 + $0xd0] sm:$0xff]  ;;  %v128_v41 = vld [vmem:[#allocation2 + $0x158] sm:$0xff]  ;;  %v130_v43 = vld [vmem:[#allocation2 + $0x168] sm:$0xff]  ;;  %755 = vmatpush1.bf16.msra.mxu0 %v754_v31  ;;  %v758_v44 = vpack.c.bf16 %v115_v34, %v109_v33 }
  0x31   :  { %v124_v42 = vld [vmem:[#allocation2 + $0x138] sm:$0xff]  ;;  %v790_v45 = vpack.c.bf16 %v117_v38, %v111_v37  ;;  %v121_v46 = vld [vmem:[#allocation2 + $0x120] sm:$0xff]  ;;  %v127_v47 = vld [vmem:[#allocation2 + $0x150] sm:$0xff]  ;;  %757 = vmatprep.subr.bf16.mxu0 %v756_v35  ;;  %v760_v48 = vpack.c.bf16 %v128_v41, %v122_v39 }
  0x32   :  { %893 = vset.pattern.permute.xlu1 %v981_v22  ;;  %894 = vset.pattern.permute.xlu0 %v979_v0  ;;  %v792_v49 = vpack.c.bf16 %v130_v43, %v124_v42  ;;  %v123_v50 = vld [vmem:[#allocation2 + $0x130] sm:$0xff]  ;;  %v129_v51 = vld [vmem:[#allocation2 + $0x160] sm:$0xff]  ;;  %v134_v52 = vld [vmem:[#allocation2 + $0x188] sm:$0xff]  ;;  %v762_v56 = vpack.c.bf16 %v127_v47, %v121_v46 }
  0x33   :  { %65 = vperm.xlu1 %893, %v50_v4   ;;  %75 = vperm.xlu0 %894, %v50_v4   ;;  %v140_v53 = vld [vmem:[#allocation2 + $0x1b8] sm:$0xff]  ;;  %v142_v55 = vld [vmem:[#allocation2 + $0x1c8] sm:$0xff]  ;;  %v794_v57 = vpack.c.bf16 %v129_v51, %v123_v50  ;;  %v133_v58 = vld [vmem:[#allocation2 + $0x180] sm:$0xff] }
  0x34   :  { %787 = vmatpush1.bf16.msra.mxu1 %v786_v32  ;;  %v136_v54 = vld [vmem:[#allocation2 + $0x198] sm:$0xff]  ;;  %759 = vmatpush1.bf16.msra.mxu0 %v758_v44  ;;  %v139_v59 = vld [vmem:[#allocation2 + $0x1b0] sm:$0xff]  ;;  %v764_v60 = vpack.c.bf16 %v140_v53, %v134_v52  ;;  %v141_v63 = vld [vmem:[#allocation2 + $0x1c0] sm:$0xff] }
  0x35   :  { %789 = vmatprep.subr.bf16.mxu1 %v788_v36  ;;  %761 = vmatprep.subr.bf16.mxu0 %v760_v48  ;;  %v796_v61 = vpack.c.bf16 %v142_v55, %v136_v54  ;;  %v135_v62 = vld [vmem:[#allocation2 + $0x190] sm:$0xff]  ;;  %v146_v0 = vld [vmem:[#allocation2 + $0x1e8] sm:$0xff]  ;;  %v152_v1 = vld [vmem:[#allocation2 + $0x218] sm:$0xff]  ;;  %v766_v4 = vpack.c.bf16 %v139_v59, %v133_v58 }
  0x36   :  { %v148_v2 = vld [vmem:[#allocation2 + $0x1f8] sm:$0xff]  ;;  %v154_v3 = vld [vmem:[#allocation2 + $0x228] sm:$0xff]  ;;  %v798_v5 = vpack.c.bf16 %v141_v63, %v135_v62  ;;  %v145_v6 = vld [vmem:[#allocation2 + $0x1e0] sm:$0xff]  ;;  %v768_v8 = vpack.c.bf16 %v152_v1, %v146_v0  ;;  %v983_v1 = vmov 1.0  }
  0x37   :  { %v151_v7 = vld [vmem:[#allocation2 + $0x210] sm:$0xff]  ;;  %v800_v9 = vpack.c.bf16 %v154_v3, %v148_v2  ;;  %v153_v11 = vld [vmem:[#allocation2 + $0x220] sm:$0xff]  ;;  %v158_v12 = vld [vmem:[#allocation2 + $0x248] sm:$0xff] }
  0x38   :  { %791 = vmatpush1.bf16.msra.mxu1 %v790_v45  ;;  %763 = vmatpush1.bf16.msra.mxu0 %v762_v56  ;;  %v147_v10 = vld [vmem:[#allocation2 + $0x1f0] sm:$0xff]  ;;  %v164_v13 = vld [vmem:[#allocation2 + $0x278] sm:$0xff]  ;;  %v166_v15 = vld [vmem:[#allocation2 + $0x288] sm:$0xff]  ;;  %v770_v16 = vpack.c.bf16 %v151_v7, %v145_v6  ;;  %v51_v45 = vlaneseq }
  0x39   :  { %793 = vmatprep.subr.bf16.mxu1 %v792_v49  ;;  %765 = vmatprep.subr.bf16.mxu0 %v764_v60  ;;  %v160_v14 = vld [vmem:[#allocation2 + $0x258] sm:$0xff]  ;;  %v802_v17 = vpack.c.bf16 %v153_v11, %v147_v10  ;;  %v157_v18 = vld [vmem:[#allocation2 + $0x240] sm:$0xff]  ;;  %v163_v19 = vld [vmem:[#allocation2 + $0x270] sm:$0xff]  ;;  %v772_v20 = vpack.c.bf16 %v164_v13, %v158_v12 }
  0x3a   :  { %v804_v21 = vpack.c.bf16 %v166_v15, %v160_v14  ;;  %v159_v22 = vld [vmem:[#allocation2 + $0x250] sm:$0xff]  ;;  %v165_v23 = vld [vmem:[#allocation2 + $0x280] sm:$0xff]  ;;  %v170_v24 = vld [vmem:[#allocation2 + $0x2a8] sm:$0xff]  ;;  %v774_v28 = vpack.c.bf16 %v163_v19, %v157_v18  ;;  %v52_v48 = vand.u32 127, %v51_v45 }
  0x3b   :  { %v176_v25 = vld [vmem:[#allocation2 + $0x2d8] sm:$0xff]  ;;  %v178_v27 = vld [vmem:[#allocation2 + $0x2e8] sm:$0xff]  ;;  %v806_v29 = vpack.c.bf16 %v165_v23, %v159_v22  ;;  %v169_v30 = vld [vmem:[#allocation2 + $0x2a0] sm:$0xff] }
  0x3c   :  { %795 = vmatpush1.bf16.msra.mxu1 %v794_v57  ;;  %767 = vmatpush1.bf16.msra.mxu0 %v766_v4  ;;  %v172_v26 = vld [vmem:[#allocation2 + $0x2b8] sm:$0xff]  ;;  %v175_v31 = vld [vmem:[#allocation2 + $0x2d0] sm:$0xff]  ;;  %v776_v32 = vpack.c.bf16 %v176_v25, %v170_v24  ;;  %v177_v35 = vld [vmem:[#allocation2 + $0x2e0] sm:$0xff] }
  0x3d   :  { %797 = vmatprep.subr.bf16.mxu1 %v796_v61  ;;  %769 = vmatprep.subr.bf16.mxu0 %v768_v8  ;;  %v808_v33 = vpack.c.bf16 %v178_v27, %v172_v26  ;;  %v171_v34 = vld [vmem:[#allocation2 + $0x2b0] sm:$0xff]  ;;  %v90_v36 = vld [vmem:[#allocation2 + $0x28] sm:$0xff]  ;;  %v96_v37 = vld [vmem:[#allocation2 + $0x58] sm:$0xff]  ;;  %v778_v41 = vpack.c.bf16 %v175_v31, %v169_v30 }
  0x3e   :  { %v412_v38 = vld [vmem:[#allocation5] sm:$0xff]  ;;  %v413_v39 = vld [vmem:[#allocation5 + $0x8] sm:$0xff]  ;;  %v810_v42 = vpack.c.bf16 %v177_v35, %v171_v34  ;;  %v812_v43 = vpack.c.bf16 %v96_v37, %v90_v36  ;;  %v95_v50 = vld [vmem:[#allocation2 + $0x50] sm:$0xff] }
  0x3f   :  { %v844_v44 = vpack.c.bf16 %v413_v39, %v412_v38  ;;  %v89_v49 = vld [vmem:[#allocation2 + $0x20] sm:$0xff]  ;;  %v102_v51 = vld [vmem:[#allocation2 + $0x88] sm:$0xff]  ;;  %v108_v52 = vld [vmem:[#allocation2 + $0xb8] sm:$0xff] }
  0x40   :  { %799 = vmatpush1.bf16.msra.mxu1 %v798_v5  ;;  %771 = vmatpush1.bf16.msra.mxu0 %v770_v16  ;;  %v414_v53 = vld [vmem:[#allocation5 + $0x10] sm:$0xff]  ;;  %v415_v54 = vld [vmem:[#allocation5 + $0x18] sm:$0xff]  ;;  %v814_v57 = vpack.c.bf16 %v95_v50, %v89_v49  ;;  %v816_v58 = vpack.c.bf16 %v108_v52, %v102_v51  ;;  %v101_v60 = vld [vmem:[#allocation2 + $0x80] sm:$0xff] }
  0x41   :  { %801 = vmatprep.subr.bf16.mxu1 %v800_v9  ;;  %773 = vmatprep.subr.bf16.mxu0 %v772_v20  ;;  %v848_v59 = vpack.c.bf16 %v415_v54, %v414_v53  ;;  %v107_v61 = vld [vmem:[#allocation2 + $0xb0] sm:$0xff]  ;;  %v114_v63 = vld [vmem:[#allocation2 + $0xe8] sm:$0xff]  ;;  %v120_v0 = vld [vmem:[#allocation2 + $0x118] sm:$0xff] }
  0x42   :  { %v416_v2 = vld [vmem:[#allocation5 + $0x20] sm:$0xff]  ;;  %v417_v3 = vld [vmem:[#allocation5 + $0x28] sm:$0xff]  ;;  %v818_v6 = vpack.c.bf16 %v107_v61, %v101_v60  ;;  %v820_v8 = vpack.c.bf16 %v120_v0, %v114_v63  ;;  %v119_v9 = vld [vmem:[#allocation2 + $0x110] sm:$0xff]  ;;  %v984_v60 = vmov 36  }
  0x43   :  { %v113_v7 = vld [vmem:[#allocation2 + $0xe0] sm:$0xff]  ;;  %v126_v10 = vld [vmem:[#allocation2 + $0x148] sm:$0xff]  ;;  %v132_v11 = vld [vmem:[#allocation2 + $0x178] sm:$0xff]  ;;  %v852_v12 = vpack.c.bf16 %v417_v3, %v416_v2  ;;  %895 = vset.pattern.permute.xlu1 %v984_v60  ;;  %896 = vset.pattern.permute.xlu0 %v984_v60 }
  0x44   :  { %803 = vmatpush1.bf16.msra.mxu1 %v802_v17  ;;  %775 = vmatpush1.bf16.msra.mxu0 %v774_v28  ;;  %v418_v13 = vld [vmem:[#allocation5 + $0x30] sm:$0xff]  ;;  %v419_v14 = vld [vmem:[#allocation5 + $0x38] sm:$0xff]  ;;  %v822_v16 = vpack.c.bf16 %v119_v9, %v113_v7  ;;  %v824_v17 = vpack.c.bf16 %v132_v11, %v126_v10  ;;  %v125_v19 = vld [vmem:[#allocation2 + $0x140] sm:$0xff] }
  0x45   :  { %805 = vmatprep.subr.bf16.mxu1 %v804_v21  ;;  %777 = vmatprep.subr.bf16.mxu0 %v776_v32  ;;  %v856_v18 = vpack.c.bf16 %v419_v14, %v418_v13  ;;  %v131_v20 = vld [vmem:[#allocation2 + $0x170] sm:$0xff]  ;;  %v138_v21 = vld [vmem:[#allocation2 + $0x1a8] sm:$0xff]  ;;  %v144_v22 = vld [vmem:[#allocation2 + $0x1d8] sm:$0xff] }
  0x46   :  { %v420_v23 = vld [vmem:[#allocation5 + $0x40] sm:$0xff]  ;;  %v421_v24 = vld [vmem:[#allocation5 + $0x48] sm:$0xff]  ;;  %v826_v25 = vpack.c.bf16 %v131_v20, %v125_v19  ;;  %v828_v26 = vpack.c.bf16 %v144_v22, %v138_v21  ;;  %v156_v31 = vld [vmem:[#allocation2 + $0x238] sm:$0xff] }
  0x47   :  { %v860_v27 = vpack.c.bf16 %v421_v24, %v420_v23  ;;  %v137_v28 = vld [vmem:[#allocation2 + $0x1a0] sm:$0xff]  ;;  %v150_v30 = vld [vmem:[#allocation2 + $0x208] sm:$0xff]  ;;  %v422_v32 = vld [vmem:[#allocation5 + $0x50] sm:$0xff] }
  0x48   :  { %807 = vmatpush1.bf16.msra.mxu1 %v806_v29  ;;  %779 = vmatpush1.bf16.msra.mxu0 %v778_v41  ;;  %v143_v29 = vld [vmem:[#allocation2 + $0x1d0] sm:$0xff]  ;;  %v832_v35 = vpack.c.bf16 %v156_v31, %v150_v30  ;;  %v149_v37 = vld [vmem:[#allocation2 + $0x200] sm:$0xff]  ;;  %v162_v39 = vld [vmem:[#allocation2 + $0x268] sm:$0xff]  ;;  %v570_v30 = vshrl.u32 %v51_v45, 7 }
  0x49   :  { %809 = vmatprep.subr.bf16.mxu1 %v808_v33  ;;  %813 = vmatprep.subr.bf16.mxu0 %v812_v43  ;;  %v423_v33 = vld [vmem:[#allocation5 + $0x58] sm:$0xff]  ;;  %v830_v34 = vpack.c.bf16 %v143_v29, %v137_v28  ;;  %v155_v38 = vld [vmem:[#allocation2 + $0x230] sm:$0xff]  ;;  %v425_v43 = vld [vmem:[#allocation5 + $0x68] sm:$0xff] }
  0x4a   :  { %v864_v36 = vpack.c.bf16 %v423_v33, %v422_v32  ;;  %v168_v41 = vld [vmem:[#allocation2 + $0x298] sm:$0xff]  ;;  %v167_v49 = vld [vmem:[#allocation2 + $0x290] sm:$0xff]  ;;  %v174_v50 = vld [vmem:[#allocation2 + $0x2c8] sm:$0xff]  ;;  %v571_v33 = vsub.s32 0, %v570_v30 }
  0x4b   :  { %v180_v51 = vld [vmem:[#allocation2 + $0x2f8] sm:$0xff]  ;;  %v426_v52 = vld [vmem:[#allocation5 + $0x70] sm:$0xff] }
  0x4c   :  { %811 = vmatpush1.bf16.msra.mxu1 %v810_v42  ;;  %v424_v42 = vld [vmem:[#allocation5 + $0x60] sm:$0xff]  ;;  %v427_v53 = vld [vmem:[#allocation5 + $0x78] sm:$0xff] }
  0x4d   :  { %845 = vmatprep.subr.bf16.mxu1 %v844_v44 }
  0xa8   :  { %v55_v46 = vpop.permute.xlu0 %54  ;;  %v73_v47 = vpop.permute.xlu1 %72 }
  0xa9   :  { %vm77_vm0 = vcmp.eq.s32.totalorder %v52_v48, %v73_v47  ;;  %vm59_vm1 = vcmp.eq.s32.totalorder %v52_v48, %v55_v46  ;;  %v836_v46 = vpack.c.bf16 %v168_v41, %v162_v39  ;;  %v868_v47 = vpack.c.bf16 %v425_v43, %v424_v42 }
  0xaa   :  { %v591_v39 = vsub.s32 5, %v570_v30 }
  0xad   :  { %v63_v55 = vpop.permute.xlu0 %62  ;;  %v58_v56 = vpop.permute.xlu1 %57 }
  0xae   :  { %vm67_vm2 = vcmp.eq.s32.totalorder %v52_v48, %v63_v55  ;;  %vm60_vm5 = vcmp.eq.s32.totalorder %v52_v48, %v58_v56  ;;  %v840_v55 = vpack.c.bf16 %v180_v51, %v174_v50  ;;  %v872_v56 = vpack.c.bf16 %v427_v53, %v426_v52 }
  0xaf   :  { %vm69_vm3 = vmor %vm59_vm1, %vm67_vm2 }
  0xb0   :  { %vm1052_vm4 = vmor %vm69_vm3, %vm77_vm0 }
  0xb1   :  { %687 = vmatmul.mubr.msk.f32.vlgmr.msra.gmra.mrb[0].mxu0 %vm1052_vm4, %v983_v1  ;;  %689 = vmatmul.mubr.msk.f32.vlgmr.msra.gmra.mrb[0].mxu1 %vm1052_vm4, %v983_v1  ;;  %v685_v10 = vsel %vm1052_vm4, 1.0, %v982_v40 }
  0xb2   :  { %815 = vmatpush1.bf16.msra.mxu0 %v814_v57  ;;  %847 = vmatpush3.bf16.msra.mxu1 %v844_v44  ;;  %v66_v4 = vpop.permute.xlu1 %65  ;;  %v76_v5 = vpop.permute.xlu0 %75  ;;  %v834_v44 = vpack.c.bf16 %v155_v38, %v149_v37  ;;  %v173_v57 = vld [vmem:[#allocation2 + $0x2c0] sm:$0xff]  ;;  %v583_v37 = vsub.s32 3, %v570_v30  ;;  %v587_v38 = vsub.s32 4, %v570_v30 }
  0xb3   :  { %vm68_vm6 = vcmp.eq.s32.totalorder %v52_v48, %v66_v4  ;;  %vm78_vm7 = vcmp.eq.s32.totalorder %v52_v48, %v76_v5  ;;  %817 = vmatprep.subr.bf16.mxu0 %v816_v58  ;;  %849 = vmatprep.subr.bf16.mxu1 %v848_v59  ;;  %v161_v48 = vld [vmem:[#allocation2 + $0x260] sm:$0xff]  ;;  %v179_v58 = vld [vmem:[#allocation2 + $0x2f0] sm:$0xff] }
  0xb4   :  { %vm70_vm8 = vmor %vm60_vm5, %vm68_vm6  ;;  %328 = vmatprep.mubr.f32.mxu1 %v982_v40  ;;  %251 = vmatprep.mubr.f32.mxu0 %v982_v40  ;;  %v838_v54 = vpack.c.bf16 %v167_v49, %v161_v48  ;;  %v611_v49 = vld [vmem:[%s1165_s4] sm:$0x3f]  ;;  %s985_s4 = smov [#allocation7]  }
  0xb5   :  { %vm1065_vm9 = vmor %vm70_vm8, %vm78_vm7  ;;  %s672_s25 = sshll.u32 %s985_s4, 4  ;;  %s673_s25 = int_to_ptr.vmem [resolvable:$true] %s672_s25 }
  0xb6   :  { %819 = vmatpush1.bf16.msra.mxu0 %v818_v6  ;;  %851 = vmatpush3.bf16.msra.mxu1 %v848_v59  ;;  %v842_v59 = vpack.c.bf16 %v179_v58, %v173_v57  ;;  %s945_s26 = scalar_lea.vmem %s673_s25, 1536  ;;  %p950_p3 = scmp.lt.s32.totalorder %s673_s25, %s673_s25 }
  0xb7   :  { %690 = vmatmul.mubr.msk.f32.gmra.mrb[2].mxu1 %vm1065_vm9, %v983_v1  ;;  %821 = vmatprep.subr.bf16.mxu0 %v820_v8  ;;  %v686_v8 = vsel %vm1065_vm9, 1.0, %v982_v40  ;;  %p946_p2 = scmp.ne.s32.totalorder %s673_s25, %s945_s26  ;;  %p951_p4 = scmp.lt.s32.totalorder %s945_s26, %s945_s26 }
  0xb8   :  { %745 = vmatprep.mubr.msk.f32.mxu1 %vm1052_vm4, %v983_v1  ;;  %853 = vmatprep.subr.bf16.mxu1 %v852_v12 }
  0xb9   :  { %688 = vmatmul.mubr.msk.f32.gmra.mrb[2].mxu0 %vm1065_vm9, %v983_v1  ;;  %p952_p5 = por %p951_p4, %p950_p3 }
  0xba   :  { %823 = vmatpush1.bf16.msra.mxu0 %v822_v16  ;;  %855 = vmatpush3.bf16.msra.mxu1 %v852_v12 }
  0xbb   :  { %825 = vmatprep.subr.bf16.mxu0 %v824_v17  ;;  %857 = vmatprep.subr.bf16.mxu1 %v856_v18  ;;  %p953_p6 = pnand %p952_p5, %p946_p2 }
  0xbc   :  { %399 = vmatprep.mubr.f32.mxu0 %v982_v40 }
  0xbe   :  { %827 = vmatpush1.bf16.msra.mxu0 %v826_v25  ;;  %859 = vmatpush3.bf16.msra.mxu1 %v856_v18 }
  0xbf   :  { %829 = vmatprep.subr.bf16.mxu0 %v828_v26  ;;  %861 = vmatprep.subr.bf16.mxu1 %v860_v27 }
  0xc2   :  { %831 = vmatpush1.bf16.msra.mxu0 %v830_v34  ;;  %863 = vmatpush3.bf16.msra.mxu1 %v860_v27  ;;  %v575_v34 = vsub.s32 1, %v570_v30 }
  0xc3   :  { %833 = vmatprep.subr.bf16.mxu0 %v832_v35  ;;  %865 = vmatprep.subr.bf16.mxu1 %v864_v36  ;;  %v567_v35 = vld [vmem:[%s1164_s3] sm:$0x3f] }
  0xc4   :  { %v572_v52 = vrot.slane %v567_v35, %v571_v33  ;;  %v576_v53 = vrot.slane %v567_v35, %v575_v34  ;;  %v592_v57 = vrot.slane %v567_v35, %v591_v39  ;;  %v620_v60 = vrot.slane %v611_v49, %v575_v34 }
  0xc6   :  { %835 = vmatpush1.bf16.msra.mxu0 %v834_v44  ;;  %867 = vmatpush3.bf16.msra.mxu1 %v864_v36  ;;  %v579_v36 = vsub.s32 2, %v570_v30 }
  0xc7   :  { %837 = vmatprep.subr.bf16.mxu0 %v836_v46  ;;  %869 = vmatprep.subr.bf16.mxu1 %v868_v47 }
  0xca   :  { %839 = vmatpush1.bf16.msra.mxu0 %v838_v54  ;;  %871 = vmatpush3.bf16.msra.mxu1 %v868_v47  ;;  %v580_v54 = vrot.slane %v567_v35, %v579_v36 }
  0xcb   :  { %841 = vmatprep.subr.bf16.mxu0 %v840_v55  ;;  %873 = vmatprep.subr.bf16.mxu1 %v872_v56  ;;  %v584_v55 = vrot.slane %v567_v35, %v583_v37 }
  0xce   :  { %843 = vmatpush1.bf16.msra.mxu0 %v842_v59  ;;  %875 = vmatpush3.bf16.msra.mxu1 %v872_v56  ;;  %v588_v56 = vrot.slane %v567_v35, %v587_v38  ;;  %v616_v59 = vrot.slane %v611_v49, %v571_v33 }
  0xd1   :  { %691 = vmatmul.mubr.msk.f32.vlgmr.msra.gmra.mrb[4].mxu0 %vm1052_vm4, %v983_v1  ;;  %746 = vmatmul.mubr.msk.f32.vlgmr.msra.gmra.mrb[4].mxu1 %vm1065_vm9, %v983_v1 }
  0xd2   :  { %405 = vmatprep.mubr.f32.mxu0 %v982_v40 }
  0xd5   :  { %692 = vmatmul.mubr.msk.f32.gmra.mrb[6].mxu0 %vm1065_vm9, %v983_v1 }
 0x184   :  { %v1089_v61 = vpop.f32.mrb[0].mxu0  ;;  %v1091_v63 = vpop.f32.mrb[0].mxu1 }
 0x185   :  { %v1093_v0 = vpop.f32.mrb[1].mxu0  ;;  %v1095_v2 = vpop.f32.mrb[1].mxu1 }
 0x18a   :  { %v1097_v3 = vpop.f32.mrb[2].mxu1 }
 0x18b   :  { %v1099_v4 = vpop.f32.mrb[3].mxu1 }
 0x18c   :  { %v1101_v5 = vpop.f32.mrb[2].mxu0 }
 0x18d   :  { %v1103_v6 = vpop.f32.mrb[3].mxu0 }
 0x1a4   :  { %v1105_v1 = vpop.f32.mrb[4].mxu0  ;;  %v747_v7 = vpop.f32.mrb[4].mxu1 }
 0x1a5   :  { %v1110_v9 = vpop.f32.mrb[5].mxu0  ;;  %v494_v11 = vpop.f32.mrb[5].mxu1  ;;  %v504_v12 = vmul.f32 %v747_v7, %v686_v8  ;;  %v510_v18 = vmul.f32 0.0013020834, %v747_v7  ;;  %v632_v7 = vrot.slane %v611_v49, %v587_v38  ;;  %v636_v8 = vrot.slane %v611_v49, %v591_v39 }
 0x1a6   :  { %v503_v13 = vmul.f32 %v685_v10, %v494_v11  ;;  %v509_v17 = vmul.f32 0.0013020834, %v494_v11 }
 0x1a7   :  { %507 = vadd.xlane.f32.xlu0 %v504_v12  ;;  %v514_v19 = vmul.f32 %v510_v18, %v510_v18 }
 0x1a8   :  { %505 = vadd.xlane.f32.xlu1 %v503_v13  ;;  %v1115_v14 = vpop.f32.mrb[6].mxu0  ;;  %v513_v22 = vmul.f32 %v509_v17, %v509_v17 }
 0x1a9   :  { %v1117_v16 = vpop.f32.mrb[7].mxu0 }
 0x1b9   :  { %525 = vperm.xlu1 %895, %v509_v17  }
 0x1bd   :  { %530 = vperm.xlu0 %896, %v510_v18  }
 0x234   :  { %v508_v15 = vpop.xlane.xlu0 %507 }
 0x235   :  { %v512_v20 = vmul.f32 0.0013020834, %v508_v15  ;;  %v506_v21 = vpop.xlane.xlu1 %505 }
 0x236   :  { %v511_v62 = vmul.f32 0.0013020834, %v506_v21 }
 0x237   :  { %v516_v40 = vsub.f32 %v512_v20, %v514_v19 }
 0x238   :  { %v515_v23 = vsub.f32 %v511_v62, %v513_v22 }
 0x239   :  { %v518_v24 = vmax.f32 %v516_v40, 0.0  ;;  %v526_v31 = vpop.permute.xlu1 %525 }
 0x23a   :  { %v517_v25 = vmax.f32 %v515_v23, 0.0  ;;  %v533_v41 = vsub.f32 %v1089_v61, %v526_v31  ;;  %v534_v42 = vsub.f32 %v1093_v0, %v526_v31  ;;  %v535_v43 = vsub.f32 %v1091_v63, %v526_v31 }
 0x23b   :  { %v520_v27 = vadd.f32 1e-05, %v518_v24  ;;  %v536_v45 = vsub.f32 %v1095_v2, %v526_v31  ;;  %v537_v44 = vsub.f32 %v1105_v1, %v526_v31  ;;  %v538_v46 = vsub.f32 %v1110_v9, %v526_v31 }
 0x23c   :  { %v519_v26 = vadd.f32 1e-05, %v517_v25  ;;  %v1120_v32 = vpop.permute.xlu0 %530  ;;  %v624_v61 = vrot.slane %v611_v49, %v579_v36  ;;  %v628_v63 = vrot.slane %v611_v49, %v583_v37 }
 0x23d   :  { %v539_v47 = vsub.f32 %v1101_v5, %v1120_v32  ;;  %v540_v48 = vsub.f32 %v1103_v6, %v1120_v32  ;;  %v541_v50 = vsub.f32 %v1097_v3, %v1120_v32  ;;  %v542_v51 = vsub.f32 %v1099_v4, %v1120_v32 }
 0x23e   :  { %897 = vrsqrt.f32 %v519_v26  ;;  %v543_v12 = vsub.f32 %v1115_v14, %v1120_v32  ;;  %v544_v13 = vsub.f32 %v1117_v16, %v1120_v32 }
 0x23f   :  { %899 = vrsqrt.f32 %v520_v27 }
 0x248   :  { %v898_v28 = vpop.eup %897 }
 0x249   :  { %547 = vperm.xlu1 %895, %v898_v28   ;;  %v900_v29 = vpop.eup %899 }
 0x24d   :  { %552 = vperm.xlu1 %895, %v900_v29  }
 0x2c8   :  { %v548_v58 = vpop.permute.xlu1 %547 }
 0x2c9   :  { %v555_v0 = vmul.f32 %v548_v58, %v533_v41  ;;  %v556_v2 = vmul.f32 %v548_v58, %v534_v42  ;;  %v557_v5 = vmul.f32 %v548_v58, %v535_v43  ;;  %v558_v6 = vmul.f32 %v548_v58, %v536_v45 }
 0x2ca   :  { %v559_v1 = vmul.f32 %v548_v58, %v537_v44  ;;  %v560_v3 = vmul.f32 %v548_v58, %v538_v46 }
 0x2cb   :  { %v599_v4 = vmul.f32 %v572_v52, %v555_v0  ;;  %v600_v9 = vmul.f32 %v576_v53, %v556_v2  ;;  %v601_v10 = vmul.f32 %v580_v54, %v557_v5  ;;  %v602_v11 = vmul.f32 %v584_v55, %v558_v6 }
 0x2cc   :  { %v603_v17 = vmul.f32 %v588_v56, %v559_v1  ;;  %v604_v18 = vmul.f32 %v592_v57, %v560_v3  ;;  %v553_v15 = vpop.permute.xlu1 %552 }
 0x2cd   :  { %v643_v19 = vadd.f32 %v616_v59, %v599_v4  ;;  %v644_v20 = vadd.f32 %v620_v60, %v600_v9  ;;  %v645_v21 = vadd.f32 %v624_v61, %v601_v10  ;;  %v646_v22 = vadd.f32 %v628_v63, %v602_v11 }
 0x2ce   :  { %v647_v62 = vadd.f32 %v632_v7, %v603_v17  ;;  %v648_v40 = vadd.f32 %v636_v8, %v604_v18  ;;  %v561_v23 = vmul.f32 %v553_v15, %v539_v47  ;;  %v562_v24 = vmul.f32 %v553_v15, %v540_v48 }
 0x2cf   :  { %655 = vst [vmem:[#allocation7] sm:$0xff] %v643_v19  ;;  %656 = vst [vmem:[#allocation7 + $0x8] sm:$0xff] %v644_v20  ;;  %v563_v25 = vmul.f32 %v553_v15, %v541_v50  ;;  %v564_v14 = vmul.f32 %v553_v15, %v542_v51  ;;  %v565_v26 = vmul.f32 %v553_v15, %v543_v12 }
 0x2d0   :  { %657 = vst [vmem:[#allocation7 + $0x10] sm:$0xff] %v645_v21  ;;  %658 = vst [vmem:[#allocation7 + $0x18] sm:$0xff] %v646_v22  ;;  %v566_v27 = vmul.f32 %v553_v15, %v544_v13  ;;  %v605_v16 = vmul.f32 %v572_v52, %v561_v23  ;;  %v606_v28 = vmul.f32 %v576_v53, %v562_v24 }
 0x2d1   :  { %659 = vst [vmem:[#allocation7 + $0x20] sm:$0xff] %v647_v62  ;;  %660 = vst [vmem:[#allocation7 + $0x28] sm:$0xff] %v648_v40  ;;  %v607_v29 = vmul.f32 %v580_v54, %v563_v25  ;;  %v608_v30 = vmul.f32 %v584_v55, %v564_v14  ;;  %v609_v31 = vmul.f32 %v588_v56, %v565_v26 }
 0x2d2   :  { %v610_v32 = vmul.f32 %v592_v57, %v566_v27  ;;  %v649_v33 = vadd.f32 %v616_v59, %v605_v16  ;;  %v650_v34 = vadd.f32 %v620_v60, %v606_v28 }
 0x2d3   :  { %v651_v35 = vadd.f32 %v624_v61, %v607_v29  ;;  %v652_v36 = vadd.f32 %v628_v63, %v608_v30  ;;  %v653_v37 = vadd.f32 %v632_v7, %v609_v31 }
 0x2d4   :  { %v654_v38 = vadd.f32 %v636_v8, %v610_v32  ;;  %661 = vst [vmem:[#allocation7 + $0x30] sm:$0xff] %v649_v33  ;;  %662 = vst [vmem:[#allocation7 + $0x38] sm:$0xff] %v650_v34 }
 0x2d5   :  { %663 = vst [vmem:[#allocation7 + $0x40] sm:$0xff] %v651_v35  ;;  %664 = vst [vmem:[#allocation7 + $0x48] sm:$0xff] %v652_v36 }
 0x2d6   :  { %665 = vst [vmem:[#allocation7 + $0x50] sm:$0xff] %v653_v37  ;;  %666 = vst [vmem:[#allocation7 + $0x58] sm:$0xff] %v654_v38 }
 0x2d7   :  { %956 = shalt.err (!%p953_p6)
}
 0x2d8   :  { %s957_s6 = scalar_lea.hbm %s1166_s5, 1536 }
 0x2d9   :  { %p958_p7 = scmp.ne.s32.totalorder %s1166_s5, %s957_s6  ;;  %p961_p8 = scmp.lt.u32.totalorder %s957_s6, %s1166_s5 }
 0x2db   :  { %p963_p9 = pnand %p961_p8, %p958_p7 }
 0x2dd   :  { %966 = shalt.err (!%p963_p9)
}
 0x2de   :  { %678 = dma.vmem_to_hbm [thread:$0]  %s673_s25, 1536, %s1166_s5, [#allocation4], %s974_s28, %s974_s28, %s975_s29  }
 0x2df   :  { %971 = dma.done.wait [#allocation4], 1536  }
 0x2e0   :  { %972 = vsyncadd [#allocation4], 4294965760 }
 0x2e1   :  { %682 = vsyncpa [#allocation3], 1 }
 0x2e2   :  { %683 = vsyncpa [#allocation6], 1 }
 0x2e3   :  { %684 = vsyncpa [#allocation4], 1 }

</bundles_post_ra>
